<compile_context>
chip_gen: v7x
topology: tpu7x:2x2x1
jax: 0.10.0
libtpu: 0.0.40
codegen_flags: <defaults>
</compile_context>

<pallas_src>
import functools

import jax
import jax.numpy as jnp
from jax import lax
from jax.experimental import pallas as pl
from jax.experimental.pallas import tpu as pltpu

NORM_EPS = 1e-5


def _round_up(x, m):
    return (x + m - 1) // m * m


# --------------------------- tiled linear (MXU) ----------------------------- #

def _matmul_kernel(x_ref, w_ref, b_ref, o_ref, acc_ref):
    # x: (tm, tk), w: (tk, tn), b: (1, tn), o: (tm, tn), acc: (tm, tn) f32
    @pl.when(pl.program_id(2) == 0)
    def _():
        acc_ref[...] = jnp.zeros_like(acc_ref)

    acc_ref[...] += jnp.dot(x_ref[...], w_ref[...],
                            preferred_element_type=jnp.float32)

    @pl.when(pl.program_id(2) == pl.num_programs(2) - 1)
    def _():
        o_ref[...] = (acc_ref[...] + b_ref[...]).astype(o_ref.dtype)


def pallas_linear(x2d, w, b, *, tm=256, tn=256, tk=512):
    """y = x2d @ w + b, tiled & pipelined. Pads to tile multiples, slices back."""
    M, K = x2d.shape
    Kw, N = w.shape
    assert Kw == K

    # clamp tiles to the (aligned) problem size so small shapes use full blocks
    tm = min(tm, _round_up(M, 8))
    tn = min(tn, _round_up(N, 128))
    tk = min(tk, _round_up(K, 128))
    Mp, Kp, Np = _round_up(M, tm), _round_up(K, tk), _round_up(N, tn)

    xp = x2d if (Mp == M and Kp == K) else jnp.pad(x2d, ((0, Mp - M), (0, Kp - K)))
    wp = w if (Kp == K and Np == N) else jnp.pad(w, ((0, Kp - K), (0, Np - N)))
    bp = (b if Np == N else jnp.pad(b, (0, Np - N))).reshape(1, Np)

    out = pl.pallas_call(
        _matmul_kernel,
        out_shape=jax.ShapeDtypeStruct((Mp, Np), x2d.dtype),
        grid=(Mp // tm, Np // tn, Kp // tk),
        in_specs=[
            pl.BlockSpec((tm, tk), lambda i, j, k: (i, k)),
            pl.BlockSpec((tk, tn), lambda i, j, k: (k, j)),
            pl.BlockSpec((1, tn), lambda i, j, k: (0, j)),
        ],
        out_specs=pl.BlockSpec((tm, tn), lambda i, j, k: (i, j)),
        scratch_shapes=[pltpu.VMEM((tm, tn), jnp.float32)],
        compiler_params=pltpu.CompilerParams(
            dimension_semantics=("parallel", "parallel", "arbitrary")),
    )(xp, wp, bp)

    if Mp != M or Np != N:
        out = out[:M, :N]
    return out


# ------------- fused q-proj + attention + out-proj (all heads / step) ------- #

def _fused_attn_kernel(x_ref, kv_ref, wq_ref, bq_ref, wp_ref, bp_ref, o_ref,
                       *, num_heads, head_dim, dim):
    # x_ref : (1, tq, C)   raw input tokens for this query tile
    # kv_ref: (1, Nk, 2C)  precomputed [k | v] (BN folded into the projection)
    # wq_ref: (C, C), bq_ref: (1, C)       -- softmax scale already folded in
    # wp_ref: (C, C_out), bp_ref: (1, C_out)
    # o_ref : (1, tq, C_out)               -- lane-dense final layout
    x = x_ref[0]
    kv = kv_ref[0]

    # q projection on the MXU (kept in f32)
    q = jnp.dot(x, wq_ref[...], preferred_element_type=jnp.float32) + bq_ref[...]

    outs = []
    for h in range(num_heads):
        lo = h * head_dim
        hi = lo + head_dim
        qh = q[:, lo:hi]                       # (tq, D)
        kh = kv[:, lo:hi]                      # (Nk, D)
        vh = kv[:, dim + lo:dim + hi]          # (Nk, D)

        # scores: contract last dims -> no materialized k transpose
        s = lax.dot_general(qh, kh, (((1,), (1,)), ((), ())),
                            preferred_element_type=jnp.float32)   # (tq, Nk)
        s = s - jnp.max(s, axis=-1, keepdims=True)
        p = jnp.exp(s)
        denom = jnp.sum(p, axis=-1, keepdims=True)
        p = p * pl.reciprocal(denom, approx=True)                 # EUP, not VALU

        oh = lax.dot_general(p, vh, (((1,), (0,)), ((), ())),
                             preferred_element_type=jnp.float32)  # (tq, D)
        outs.append(oh)

    o = jnp.concatenate(outs, axis=-1)                            # (tq, C)
    # fused output projection -> saves an HBM round trip of the attention out
    o_ref[0] = (jnp.dot(o, wp_ref[...], preferred_element_type=jnp.float32)
                + bp_ref[...]).astype(o_ref.dtype)


def pallas_fused_attention(x, kv, wq, bq, wp, bp, *, num_heads, head_dim):
    # x: (B, N, C) raw tokens, kv: (B, Nk, 2C)
    B, N, C = x.shape
    Nk = kv.shape[1]
    C_out = wp.shape[1]

    tq = min(128, _round_up(N, 8))             # query tiling keeps (tq, Nk) small
    Npad = _round_up(N, tq)
    if Npad != N:
        x = jnp.pad(x, ((0, 0), (0, Npad - N), (0, 0)))

    bq2 = bq.reshape(1, C)
    bp2 = bp.reshape(1, C_out)

    out = pl.pallas_call(
        functools.partial(_fused_attn_kernel, num_heads=num_heads,
                          head_dim=head_dim, dim=C),
        out_shape=jax.ShapeDtypeStruct((B, Npad, C_out), x.dtype),
        grid=(B, Npad // tq),
        in_specs=[
            pl.BlockSpec((1, tq, C), lambda b, i: (b, i, 0)),
            pl.BlockSpec((1, Nk, 2 * C), lambda b, i: (b, 0, 0)),   # resident per batch
            pl.BlockSpec((C, C), lambda b, i: (0, 0)),              # Wq resident
            pl.BlockSpec((1, C), lambda b, i: (0, 0)),
            pl.BlockSpec((C, C_out), lambda b, i: (0, 0)),          # Wp resident
            pl.BlockSpec((1, C_out), lambda b, i: (0, 0)),
        ],
        out_specs=pl.BlockSpec((1, tq, C_out), lambda b, i: (b, i, 0)),
        compiler_params=pltpu.CompilerParams(
            dimension_semantics=("parallel", "parallel")),
    )(x, kv, wq, bq2, wp, bp2)

    if Npad != N:
        out = out[:, :N, :]
    return out


# ------------------------------ E_MHSA forward ------------------------------ #

def e_mhsa_forward(x, params, *, head_dim, sr_ratio):
    B, N, C = x.shape
    num_heads = C // head_dim
    scale = head_dim ** (-0.5)

    # fold the softmax scale into the q projection (one-time constant fold)
    wq = params["wq"] * scale
    bq = params["bq"] * scale

    # fused k|v projection weights: x_ is read once, wider MXU N dimension
    wkv = jnp.concatenate([params["wk"], params["wv"]], axis=1)   # (C, 2C)
    bkv = jnp.concatenate([params["bk"], params["bv"]], axis=0)   # (2C,)

    if sr_ratio > 1:
        n_ratio = sr_ratio ** 2
        Nk = N // n_ratio
        # AvgPool1d(kernel=stride=N_ratio) over the token dim, directly on (B,N,C)
        x_ = x.reshape(B, Nk, n_ratio, C).mean(axis=2)            # (B, Nk, C)
        # Fold BatchNorm1d (running-stats / inference) into the kv projection:
        #   (x_*gamma + beta) @ Wkv + bkv == x_ @ (gamma[:,None]*Wkv) + (beta@Wkv + bkv)
        inv_std = lax.rsqrt(params["bn_var"] + NORM_EPS)
        gamma = params["bn_w"] * inv_std
        beta = params["bn_b"] - params["bn_mean"] * gamma
        bkv = beta @ wkv + bkv
        wkv = gamma[:, None] * wkv
    else:
        Nk = N
        x_ = x

    kv = pallas_linear(x_.reshape(B * Nk, C), wkv, bkv).reshape(B, Nk, 2 * C)

    # fused: q-projection + all-heads attention + output projection per
    # (batch, q-tile) grid step, lane-dense (B, N, C_out) output.
    out = pallas_fused_attention(x, kv, wq, bq, params["wp"], params["bp"],
                                 num_heads=num_heads, head_dim=head_dim)
    return out


# ------------------------------- reference ---------------------------------- #

def e_mhsa_reference(x, params, *, head_dim, sr_ratio):
    B, N, C = x.shape
    H = C // head_dim
    scale = head_dim ** (-0.5)
    dot = functools.partial(jnp.einsum, precision=jax.lax.Precision.HIGHEST)

    q = dot("bnc,cd->bnd", x, params["wq"]) + params["bq"]
    if sr_ratio > 1:
        n_ratio = sr_ratio ** 2
        Nk = N // n_ratio
        x_ = jnp.transpose(x, (0, 2, 1)).reshape(B, C, Nk, n_ratio).mean(-1)
        inv_std = 1.0 / jnp.sqrt(params["bn_var"] + NORM_EPS)
        x_ = (x_ - params["bn_mean"][None, :, None]) * (params["bn_w"] * inv_std)[None, :, None] \
             + params["bn_b"][None, :, None]
        x_ = jnp.transpose(x_, (0, 2, 1))
    else:
        Nk = N
        x_ = x
    k = dot("bnc,cd->bnd", x_, params["wk"]) + params["bk"]
    v = dot("bnc,cd->bnd", x_, params["wv"]) + params["bv"]

    qh = q.reshape(B, N, H, head_dim).transpose(0, 2, 1, 3)
    kh = k.reshape(B, Nk, H, head_dim).transpose(0, 2, 1, 3)
    vh = v.reshape(B, Nk, H, head_dim).transpose(0, 2, 1, 3)

    attn = dot("bhnd,bhmd->bhnm", qh, kh) * scale
    attn = jax.nn.softmax(attn, axis=-1)
    o = dot("bhnm,bhmd->bhnd", attn, vh).transpose(0, 2, 1, 3).reshape(B, N, C)
    return dot("bnc,cd->bnd", o, params["wp"]) + params["bp"]


# --------------------------------- main -------------------------------------- #

if __name__ == "__main__":
    # small shapes consistent with the module
    B, N, C = 2, 16, 32          # N = 4x4 spatial tokens, dim = 32
    head_dim = 8                 # num_heads = 4
    sr_ratio = 2                 # exercises AvgPool1d + BatchNorm1d path

    key = jax.random.PRNGKey(0)
    ks = jax.random.split(key, 10)
    init = lambda k, shp: (0.05 * jax.random.normal(k, shp, dtype=jnp.float32))

    params = {
        "wq": init(ks[0], (C, C)), "bq": init(ks[1], (C,)),
        "wk": init(ks[2], (C, C)), "bk": init(ks[3], (C,)),
        "wv": init(ks[4], (C, C)), "bv": init(ks[5], (C,)),
        "wp": init(ks[6], (C, C)), "bp": init(ks[7], (C,)),
        # BatchNorm1d(dim) running stats / affine params (deterministic)
        "bn_w": 1.0 + 0.1 * jnp.arange(C, dtype=jnp.float32) / C,
        "bn_b": 0.01 * jnp.arange(C, dtype=jnp.float32),
        "bn_mean": 0.02 * jnp.arange(C, dtype=jnp.float32),
        "bn_var": 1.0 + 0.05 * jnp.arange(C, dtype=jnp.float32) / C,
    }

    x = jax.random.normal(ks[8], (B, N, C), dtype=jnp.float32)

    out = e_mhsa_forward(x, params, head_dim=head_dim, sr_ratio=sr_ratio)
    out = jax.block_until_ready(out)

    ref = e_mhsa_reference(x, params, head_dim=head_dim, sr_ratio=sr_ratio)
    assert out.shape == (B, N, C), out.shape
    assert jnp.allclose(out, ref, rtol=2e-2, atol=2e-2), \
        float(jnp.max(jnp.abs(out - ref)))

    print("KERNEL_OK")
</pallas_src>

<mosaic_0001>
module attributes {stable_mosaic.version = 11 : i64} {
  func.func @_matmul_kernel(%arg0: i32, %arg1: i32, %arg2: i32, %arg3: memref<8x128xf32, #tpu.memory_space<vmem>>, %arg4: memref<128x128xf32, #tpu.memory_space<vmem>>, %arg5: memref<1x128xf32, #tpu.memory_space<vmem>>, %arg6: memref<8x128xf32, #tpu.memory_space<vmem>>, %arg7: memref<8x128xf32, #tpu.memory_space<vmem>>) attributes {dimension_semantics = [#tpu.dimension_semantics<parallel>, #tpu.dimension_semantics<parallel>, #tpu.dimension_semantics<arbitrary>], iteration_bounds = array<i64: 1, 1, 1>, scalar_prefetch = 0 : i64, scratch_operands = 1 : i64, tpu.core_type = #tpu.core_type<tc>, window_params = [{transform_indices = @transform_0, window_bounds = array<i64: 8, 128>}, {transform_indices = @transform_1, window_bounds = array<i64: 128, 128>}, {transform_indices = @transform_2, window_bounds = array<i64: 1, 128>}, {transform_indices = @transform_3, window_bounds = array<i64: 8, 128>}]} {
    %c0_i32 = arith.constant 0 : i32
    %0 = arith.cmpi eq, %arg2, %c0_i32 : i32
    %1 = arith.extui %0 : i1 to i32
    %c0_i32_0 = arith.constant 0 : i32
    %2 = arith.cmpi ne, %1, %c0_i32_0 : i32
    scf.if %2 {
      %cst_10 = arith.constant 0.000000e+00 : f32
      %12 = vector.broadcast %cst_10 : f32 to vector<8x128xf32>
      %c0_11 = arith.constant 0 : index
      %c0_12 = arith.constant 0 : index
      %13 = vector.load %arg7[%c0_11, %c0_12] : memref<8x128xf32, #tpu.memory_space<vmem>>, vector<8x128xf32>
      tpu.vector_store %arg7[%c0_11, %c0_12], %12 {strides = array<i32>} : memref<8x128xf32, #tpu.memory_space<vmem>>, vector<8x128xf32>,
    } else {
    }
    %c0 = arith.constant 0 : index
    %c0_1 = arith.constant 0 : index
    %3 = vector.load %arg7[%c0, %c0_1] : memref<8x128xf32, #tpu.memory_space<vmem>>, vector<8x128xf32>
    %c0_2 = arith.constant 0 : index
    %c0_3 = arith.constant 0 : index
    %4 = vector.load %arg3[%c0_2, %c0_3] : memref<8x128xf32, #tpu.memory_space<vmem>>, vector<8x128xf32>
    %c0_4 = arith.constant 0 : index
    %c0_5 = arith.constant 0 : index
    %5 = vector.load %arg4[%c0_4, %c0_5] : memref<128x128xf32, #tpu.memory_space<vmem>>, vector<128x128xf32>
    %cst = arith.constant dense<0.000000e+00> : vector<8x128xf32>
    %6 = tpu.matmul %4, %5, %cst {dimension_numbers = #tpu.dot_dimension_numbers<[1], [0], [0], [1], [0, 0, 1, 1], [], []>} : vector<8x128xf32>, vector<128x128xf32>, vector<8x128xf32> -> vector<8x128xf32>
    %7 = arith.addf %3, %6 : vector<8x128xf32>
    %c0_6 = arith.constant 0 : index
    %c0_7 = arith.constant 0 : index
    %8 = vector.load %arg7[%c0_6, %c0_7] : memref<8x128xf32, #tpu.memory_space<vmem>>, vector<8x128xf32>
    tpu.vector_store %arg7[%c0_6, %c0_7], %7 {strides = array<i32>} : memref<8x128xf32, #tpu.memory_space<vmem>>, vector<8x128xf32>,
    %c0_i32_8 = arith.constant 0 : i32
    %9 = arith.cmpi eq, %arg2, %c0_i32_8 : i32
    %10 = arith.extui %9 : i1 to i32
    %c0_i32_9 = arith.constant 0 : i32
    %11 = arith.cmpi ne, %10, %c0_i32_9 : i32
    scf.if %11 {
      %c0_10 = arith.constant 0 : index
      %c0_11 = arith.constant 0 : index
      %12 = vector.load %arg7[%c0_10, %c0_11] : memref<8x128xf32, #tpu.memory_space<vmem>>, vector<8x128xf32>
      %c0_12 = arith.constant 0 : index
      %c0_13 = arith.constant 0 : index
      %13 = vector.load %arg5[%c0_12, %c0_13] : memref<1x128xf32, #tpu.memory_space<vmem>>, vector<1x128xf32>
      %14 = vector.broadcast %13 : vector<1x128xf32> to vector<8x128xf32>
      %15 = arith.addf %12, %14 : vector<8x128xf32>
      %c0_14 = arith.constant 0 : index
      %c0_15 = arith.constant 0 : index
      %16 = vector.load %arg6[%c0_14, %c0_15] : memref<8x128xf32, #tpu.memory_space<vmem>>, vector<8x128xf32>
      tpu.vector_store %arg6[%c0_14, %c0_15], %15 {strides = array<i32>} : memref<8x128xf32, #tpu.memory_space<vmem>>, vector<8x128xf32>,
    } else {
    }
    return
  }
  func.func @transform_0(%arg0: i32, %arg1: i32, %arg2: i32) -> (i32, i32) {
    %c0_i32 = arith.constant 0 : i32
    return %arg0, %arg2 : i32, i32
  }
  func.func @transform_1(%arg0: i32, %arg1: i32, %arg2: i32) -> (i32, i32) {
    %c0_i32 = arith.constant 0 : i32
    return %arg2, %arg1 : i32, i32
  }
  func.func @transform_2(%arg0: i32, %arg1: i32, %arg2: i32) -> (i32, i32) {
    %c0_i32 = arith.constant 0 : i32
    %c0_i32_0 = arith.constant 0 : i32
    return %c0_i32, %arg1 : i32, i32
  }
  func.func @transform_3(%arg0: i32, %arg1: i32, %arg2: i32) -> (i32, i32) {
    %c0_i32 = arith.constant 0 : i32
    return %arg0, %arg1 : i32, i32
  }
}

</mosaic_0001>

<bundles_post_ra>
// kernel: tpu_custom_call.1
= control target key start
LH: loop header
LB: loop body
LE: loop exit
PB: predicated region body
PF: predicated region fallthrough
CT: control target
= control target key end

     0   :  { %8 = vsyncpa [#allocation4], 0  ;;  %s396_s0 = inlined_call_operand.hbm [shape: f32[8,128], index: 0, kind: input, shape index: {}]   ;;  %s397_s1 = inlined_call_operand.hbm [shape: f32[128,128], index: 1, kind: input, shape index: {}]   ;;  %s398_s2 = inlined_call_operand.vmem [shape: f32[1,128], index: 2, kind: input, shape index: {}]   ;;  %s399_s3 = inlined_call_operand.hbm [shape: f32[8,128], index: 3, kind: output, shape index: {}]  }
   0x1   :  { %9 = vsyncpa [#allocation7], 0 }
   0x2   :  { %10 = vsyncpa [#allocation5], 0  ;;  %s322_s12 = smov [#allocation3]   ;;  %s323_s14 = smov [#allocation6]  }
   0x3   :  { %s17_s13 = sshll.u32 %s322_s12, 4  ;;  %s26_s15 = sshll.u32 %s323_s14, 4  ;;  %s18_s13 = int_to_ptr.vmem [resolvable:$true] %s17_s13  ;;  %s350_s15 = int_to_ptr.vmem [resolvable:$true] %s26_s15 }
   0x4   :  { %s250_s18 = scalar_lea.hbm %s396_s0, 128 }
   0x5   :  { %p251_p0 = scmp.ne.s32.totalorder %s396_s0, %s250_s18  ;;  %p254_p1 = scmp.lt.u32.totalorder %s250_s18, %s396_s0 }
   0x7   :  { %p256_p2 = pnand %p254_p1, %p251_p0 }
   0x9   :  { %259 = shalt.err (!%p256_p2)
}
   0xa   :  { %s260_s23 = scalar_lea.vmem %s18_s13, 128  ;;  %p265_p4 = scmp.lt.s32.totalorder %s18_s13, %s18_s13 }
   0xb   :  { %p261_p3 = scmp.ne.s32.totalorder %s18_s13, %s260_s23  ;;  %p266_p5 = scmp.lt.s32.totalorder %s260_s23, %s260_s23 }
   0xd   :  { %p267_p6 = por %p266_p5, %p265_p4 }
   0xf   :  { %p268_p7 = pnand %p267_p6, %p261_p3 }
  0x11   :  { %271 = shalt.err (!%p268_p7)
}
  0x12   :  { %20 = dma.hbm_to_vmem [thread:$0]  %s396_s0, 128, %s18_s13, [#allocation4]  }
  0x13   :  { %s272_s28 = scalar_lea.hbm %s397_s1, 2048 }
  0x14   :  { %p273_p8 = scmp.ne.s32.totalorder %s397_s1, %s272_s28  ;;  %p276_p9 = scmp.lt.u32.totalorder %s272_s28, %s397_s1 }
  0x16   :  { %p278_p10 = pnand %p276_p9, %p273_p8 }
  0x18   :  { %281 = shalt.err (!%p278_p10)
}
  0x19   :  { %s282_s6 = scalar_lea.vmem %s350_s15, 2048  ;;  %p287_p12 = scmp.lt.s32.totalorder %s350_s15, %s350_s15 }
  0x1a   :  { %p283_p11 = scmp.ne.s32.totalorder %s350_s15, %s282_s6  ;;  %p288_p13 = scmp.lt.s32.totalorder %s282_s6, %s282_s6 }
  0x1c   :  { %p289_p0 = por %p288_p13, %p287_p12 }
  0x1e   :  { %p290_p1 = pnand %p289_p0, %p283_p11 }
  0x20   :  { %293 = shalt.err (!%p290_p1)
}
  0x21   :  { %s324_s0 = smov 128   ;;  %s325_s7 = smov 8  }
  0x22   :  { %32 = dma.hbm_to_vmem [thread:$0]  %s397_s1, 2048, %s350_s15, [#allocation7], %s324_s0, %s324_s0, %s325_s7  }
  0x23   :  { %316 = dma.done.wait [#allocation4], 128  }
  0x24   :  { %317 = vsyncadd [#allocation4], 4294967168 }
  0x25   :  { %318 = dma.done.wait [#allocation7], 2048  }
  0x26   :  { %319 = vsyncadd [#allocation7], 4294965248  ;;  %v326_v0 = vmov 0.0|0.0   ;;  %vm327_vm0 = vmmov 0   ;;  %v328_v1 = vmov 0.0   ;;  %v48_v2 = vld [vmem:[#allocation6] sm:$0xff] }
  0x27   :  { %218 = vmatprep.subr.bf16.mxu0 %v326_v0  ;;  %215 = vmatprep.mubr.msk.f32.mxu0 %vm327_vm0, %v328_v1  ;;  %v49_v3 = vld [vmem:[#allocation6 + $0x8] sm:$0xff]  ;;  %v50_v4 = vld [vmem:[#allocation6 + $0x10] sm:$0xff]  ;;  %v51_v6 = vld [vmem:[#allocation6 + $0x18] sm:$0xff]  ;;  %s329_s11 = smov [#allocation8]  }
  0x28   :  { %v219_v5 = vpack.c.bf16 %v49_v3, %v48_v2  ;;  %v222_v7 = vpack.c.bf16 %v51_v6, %v50_v4  ;;  %v52_v8 = vld [vmem:[#allocation6 + $0x20] sm:$0xff]  ;;  %v53_v9 = vld [vmem:[#allocation6 + $0x28] sm:$0xff]  ;;  %v54_v11 = vld [vmem:[#allocation6 + $0x30] sm:$0xff]  ;;  %s155_s12 = sshll.u32 %s329_s11, 4  ;;  %s156_s12 = int_to_ptr.vmem [resolvable:$true] %s155_s12 }
  0x29   :  { %v225_v10 = vpack.c.bf16 %v53_v9, %v52_v8  ;;  %v55_v12 = vld [vmem:[#allocation6 + $0x38] sm:$0xff]  ;;  %v56_v14 = vld [vmem:[#allocation6 + $0x40] sm:$0xff]  ;;  %v57_v15 = vld [vmem:[#allocation6 + $0x48] sm:$0xff]  ;;  %s294_s13 = scalar_lea.vmem %s156_s12, 128  ;;  %p299_p3 = scmp.lt.s32.totalorder %s156_s12, %s156_s12 }
  0x2a   :  { %220 = vmatpush3.bf16.msra.mxu0 %v219_v5  ;;  %v228_v13 = vpack.c.bf16 %v55_v12, %v54_v11  ;;  %v231_v16 = vpack.c.bf16 %v57_v15, %v56_v14  ;;  %v58_v17 = vld [vmem:[#allocation6 + $0x50] sm:$0xff]  ;;  %v59_v18 = vld [vmem:[#allocation6 + $0x58] sm:$0xff]  ;;  %v60_v20 = vld [vmem:[#allocation6 + $0x60] sm:$0xff]  ;;  %p295_p2 = scmp.ne.s32.totalorder %s156_s12, %s294_s13  ;;  %p300_p4 = scmp.lt.s32.totalorder %s294_s13, %s294_s13 }
  0x2b   :  { %221 = vmatprep.subr.bf16.mxu0 %v326_v0  ;;  %v234_v19 = vpack.c.bf16 %v59_v18, %v58_v17  ;;  %v61_v21 = vld [vmem:[#allocation6 + $0x68] sm:$0xff]  ;;  %v62_v23 = vld [vmem:[#allocation6 + $0x70] sm:$0xff]  ;;  %v63_v24 = vld [vmem:[#allocation6 + $0x78] sm:$0xff] }
  0x2c   :  { %v237_v22 = vpack.c.bf16 %v61_v21, %v60_v20  ;;  %v240_v25 = vpack.c.bf16 %v63_v24, %v62_v23  ;;  %v47_v26 = vld [vmem:[#allocation3] sm:$0xff]  ;;  %p301_p5 = por %p300_p4, %p299_p3 }
  0x2d   :  { %v165_v27 = vld [vmem:[%s398_s2] ss:$0 sm:$0xff] }
  0x2e   :  { %223 = vmatpush3.bf16.msra.mxu0 %v222_v7  ;;  %p302_p6 = pnand %p301_p5, %p295_p2 }
  0x2f   :  { %224 = vmatprep.subr.bf16.mxu0 %v326_v0 }
  0x32   :  { %226 = vmatpush3.bf16.msra.mxu0 %v225_v10 }
  0x33   :  { %227 = vmatprep.subr.bf16.mxu0 %v326_v0 }
  0x36   :  { %229 = vmatpush3.bf16.msra.mxu0 %v228_v13 }
  0x37   :  { %230 = vmatprep.subr.bf16.mxu0 %v326_v0 }
  0x3a   :  { %232 = vmatpush3.bf16.msra.mxu0 %v231_v16 }
  0x3b   :  { %233 = vmatprep.subr.bf16.mxu0 %v326_v0 }
  0x3e   :  { %235 = vmatpush3.bf16.msra.mxu0 %v234_v19 }
  0x3f   :  { %236 = vmatprep.subr.bf16.mxu0 %v326_v0 }
  0x42   :  { %238 = vmatpush3.bf16.msra.mxu0 %v237_v22 }
  0x43   :  { %239 = vmatprep.subr.bf16.mxu0 %v326_v0 }
  0x46   :  { %241 = vmatpush3.bf16.msra.mxu0 %v240_v25 }
  0x49   :  { %216 = vmatmul.mubr.f32.vlgmr.msra.gmra.mrb[0].mxu0 %v47_v26 }
 0x11c   :  { %v130_v28 = vpop.f32.mrb[0].mxu0 }
 0x11d   :  { %v147_v29 = vadd.f32 %v165_v27, %v130_v28  ;;  %v217_v30 = vpop.f32.mrb[1].mxu0 }
 0x11f   :  { %148 = vst [vmem:[#allocation8] sm:$0xff] %v147_v29 }
 0x120   :  { %305 = shalt.err (!%p302_p6)
}
 0x121   :  { %s306_s16 = scalar_lea.hbm %s399_s3, 128 }
 0x122   :  { %p307_p7 = scmp.ne.s32.totalorder %s399_s3, %s306_s16  ;;  %p310_p8 = scmp.lt.u32.totalorder %s306_s16, %s399_s3 }
 0x124   :  { %p312_p9 = pnand %p310_p8, %p307_p7 }
 0x126   :  { %315 = shalt.err (!%p312_p9)
}
 0x127   :  { %158 = dma.vmem_to_hbm [thread:$0]  %s156_s12, 128, %s399_s3, [#allocation5]  }
 0x128   :  { %320 = dma.done.wait [#allocation5], 128  }
 0x129   :  { %321 = vsyncadd [#allocation5], 4294967168 }
 0x12a   :  { %162 = vsyncpa [#allocation4], 1 }
 0x12b   :  { %163 = vsyncpa [#allocation7], 1 }
 0x12c   :  { %164 = vsyncpa [#allocation5], 1 }

</bundles_post_ra>
